<compile_context>
chip_gen: v7x
topology: tpu7x:2x2x1
jax: 0.10.0
libtpu: 0.0.40
codegen_flags: <defaults>
</compile_context>

<pallas_src>
import functools

import jax
import jax.numpy as jnp
from jax import lax
from jax.experimental import pallas as pl
from jax.experimental.pallas import tpu as pltpu

_BF16 = jnp.bfloat16


def _pick_vmem_limit():
    """96 MiB on 128-MiB-VMEM parts (v5e/v6e); conservative 32 MiB otherwise (v7x: 64 MiB)."""
    try:
        info = pltpu.get_tpu_info()
        cap = None
        for name in ("vmem_capacity_bytes", "vmem_size_bytes", "vmem_bytes"):
            cap = getattr(info, name, None)
            if cap:
                break
        if cap and int(cap) >= 100 * 1024 * 1024:
            return 96 * 1024 * 1024
    except Exception:
        pass
    return 32 * 1024 * 1024


_VMEM_LIMIT = _pick_vmem_limit()


def _is_bf16(dtype):
    return jnp.dtype(dtype) == jnp.dtype(jnp.bfloat16)


def _pick_tile(dim, target, align):
    """Largest tile <= target that is `align`-aligned and divides dim, else full dim."""
    if dim <= target:
        return dim
    t = (target // align) * align
    while t >= align:
        if dim % t == 0:
            return t
        t -= align
    return dim


def _head_group(num_heads, head_dim):
    """Heads per attention grid step: lane width == full P, or a multiple of 128."""
    if num_heads * head_dim <= 512:
        return num_heads
    for g in range(1, num_heads + 1):
        if num_heads % g == 0 and (g * head_dim) % 128 == 0:
            return g
    return num_heads


# --------------------------------------------------------------------------
# Generic tiled linear:  out[N, F] = x[N, K] @ w[K, F] + b[F]
# --------------------------------------------------------------------------
def _linear_kernel(x_ref, w_ref, b_ref, o_ref, acc_ref, *, compute_dtype):
    k = pl.program_id(2)

    @pl.when(k == 0)
    def _():
        acc_ref[...] = jnp.zeros_like(acc_ref)

    acc_ref[...] += jnp.dot(
        x_ref[...].astype(compute_dtype),
        w_ref[...].astype(compute_dtype),
        preferred_element_type=jnp.float32,
    )

    @pl.when(k == pl.num_programs(2) - 1)
    def _():
        o_ref[...] = (acc_ref[...] + b_ref[...]).astype(o_ref.dtype)


def pallas_linear(x2d, w, b, *, compute_dtype=_BF16, out_dtype=jnp.float32,
                  tm_target=512, tn_target=512, tk_target=1024):
    """x2d: [N, K]; w: [K, F] (in,out layout -- no transpose); b: [F] -> [N, F]."""
    n, k = x2d.shape
    f = w.shape[1]
    align_m = 16 if _is_bf16(compute_dtype) else 8
    tm = _pick_tile(n, tm_target, align_m)
    tn = _pick_tile(f, tn_target, 128)
    tk = _pick_tile(k, tk_target, 128)
    b2 = b.reshape(1, f).astype(jnp.float32)
    return pl.pallas_call(
        functools.partial(_linear_kernel, compute_dtype=compute_dtype),
        out_shape=jax.ShapeDtypeStruct((n, f), out_dtype),
        grid_spec=pltpu.PrefetchScalarGridSpec(
            num_scalar_prefetch=0,
            grid=(n // tm, f // tn, k // tk),
            in_specs=[
                pl.BlockSpec((tm, tk), lambda i, j, kk: (i, kk)),
                pl.BlockSpec((tk, tn), lambda i, j, kk: (kk, j)),
                pl.BlockSpec((1, tn), lambda i, j, kk: (0, j)),
            ],
            out_specs=pl.BlockSpec((tm, tn), lambda i, j, kk: (i, j)),
            scratch_shapes=[pltpu.VMEM((tm, tn), jnp.float32)],
        ),
        compiler_params=pltpu.CompilerParams(
            dimension_semantics=("parallel", "parallel", "arbitrary"),
            vmem_limit_bytes=_VMEM_LIMIT,
        ),
    )(x2d, w, b2)


# --------------------------------------------------------------------------
# Fused QKV projection: out[3, N, P] = x[N, K] @ w3[3, K, P] + b3[3, P]
# All three parts computed per grid step from the SAME x block -> x is DMA'd
# once (bpp == 1 whenever P <= tn_target), weights once.
# --------------------------------------------------------------------------
def _qkv_kernel(x_ref, w_ref, b_ref, o_ref, acc_ref, *, compute_dtype):
    k = pl.program_id(2)

    @pl.when(k == 0)
    def _():
        acc_ref[...] = jnp.zeros_like(acc_ref)

    x = x_ref[...].astype(compute_dtype)          # one x load feeds all 3 parts
    for p in range(3):
        acc_ref[p] += jnp.dot(x, w_ref[p].astype(compute_dtype),
                              preferred_element_type=jnp.float32)

    @pl.when(k == pl.num_programs(2) - 1)
    def _():
        o_ref[...] = (acc_ref[...] + b_ref[...]).astype(o_ref.dtype)


def pallas_qkv_proj(x2d, w3, b3, *, compute_dtype=_BF16, out_dtype=None,
                    tm_target=512, tn_target=1024, tk_target=1024):
    """x2d: [N, K]; w3: [3, K, P]; b3: [3, P] -> [3, N, P] (out_dtype)."""
    n, k = x2d.shape
    p = w3.shape[2]
    if out_dtype is None:
        out_dtype = compute_dtype
    align_m = 16 if _is_bf16(compute_dtype) else 8
    tm = _pick_tile(n, tm_target, align_m)
    tn = _pick_tile(p, tn_target, 128)
    tk = _pick_tile(k, tk_target, 128)
    b3r = b3.reshape(3, 1, p).astype(jnp.float32)
    return pl.pallas_call(
        functools.partial(_qkv_kernel, compute_dtype=compute_dtype),
        out_shape=jax.ShapeDtypeStruct((3, n, p), out_dtype),
        grid_spec=pltpu.PrefetchScalarGridSpec(
            num_scalar_prefetch=0,
            grid=(n // tm, p // tn, k // tk),
            in_specs=[
                pl.BlockSpec((tm, tk), lambda i, j, kk: (i, kk)),
                pl.BlockSpec((3, tk, tn), lambda i, j, kk: (0, kk, j)),
                pl.BlockSpec((3, 1, tn), lambda i, j, kk: (0, 0, j)),
            ],
            out_specs=pl.BlockSpec((3, tm, tn), lambda i, j, kk: (0, i, j)),
            scratch_shapes=[pltpu.VMEM((3, tm, tn), jnp.float32)],
        ),
        compiler_params=pltpu.CompilerParams(
            dimension_semantics=("parallel", "parallel", "arbitrary"),
            vmem_limit_bytes=_VMEM_LIMIT,
        ),
    )(x2d, w3, b3r)


# --------------------------------------------------------------------------
# Attention: grid (B, Sq//tq, NH//G); lane-dense [tq, G*D] blocks in the
# [*, B, S, NH*D] layout.  Scale is pre-folded into the Q projection.
# --------------------------------------------------------------------------
def _attn_body(q_ref, k_ref, v_ref, bias_ref, o_ref, *, g_heads, d, compute_dtype,
               bias_per_head):
    q = q_ref[0, 0].astype(compute_dtype)   # [tq, G*D]
    k = k_ref[0, 0].astype(compute_dtype)   # [Sk, G*D]
    v = v_ref[0, 0].astype(compute_dtype)   # [Sk, G*D]

    shared_bias = None
    if bias_ref is not None and not bias_per_head:
        shared_bias = bias_ref[0, 0].astype(jnp.float32)   # hoisted once for all heads

    for g in range(g_heads):   # per-head store: one [tq,Sk] score block live at a time
        lo, hi = g * d, (g + 1) * d
        s = lax.dot_general(q[:, lo:hi], k[:, lo:hi], (((1,), (1,)), ((), ())),
                            preferred_element_type=jnp.float32)          # [tq, Sk]
        if bias_ref is not None:
            b = shared_bias if shared_bias is not None \
                else bias_ref[0, g].astype(jnp.float32)
            s = s + b
        # Guard fully-masked rows (bias all -inf): exp -> 0, denom floored, out -> 0.
        m = jnp.maximum(jnp.max(s, axis=-1, keepdims=True), -1e30)
        e = jnp.exp((s - m).astype(compute_dtype))        # bf16 exp (EUP) on v6e/v7x
        l = jnp.sum(e.astype(jnp.float32), axis=-1, keepdims=True)
        pv = jnp.dot(e, v[:, lo:hi], preferred_element_type=jnp.float32)  # [tq, D]
        inv = pl.reciprocal(jnp.maximum(l, 1e-30), approx=True)
        o_ref[0, :, lo:hi] = (pv * inv).astype(o_ref.dtype)   # normalize AFTER PV


def _attn_kernel_nobias(q_ref, k_ref, v_ref, o_ref, *, g_heads, d, compute_dtype):
    _attn_body(q_ref, k_ref, v_ref, None, o_ref, g_heads=g_heads, d=d,
               compute_dtype=compute_dtype, bias_per_head=False)


def _attn_kernel_bias(q_ref, k_ref, v_ref, bias_ref, o_ref, *, g_heads, d,
                      compute_dtype, bias_per_head):
    _attn_body(q_ref, k_ref, v_ref, bias_ref, o_ref, g_heads=g_heads, d=d,
               compute_dtype=compute_dtype, bias_per_head=bias_per_head)


def _normalize_bias(attn_bias, B, NH, Sq, Sk, dtype):
    bias = jnp.asarray(attn_bias)
    if bias.ndim == 2:
        bias = bias[None, None]
    elif bias.ndim == 3:
        bias = bias[:, None]
    bb, nhb, bsq, bsk = bias.shape
    if bsq != Sq or bsk != Sk or bb not in (1, B) or nhb not in (1, NH):
        # Rare fallback: materializes the full bias (memory/bandwidth cliff).
        bias = jnp.broadcast_to(bias, (B, NH, Sq, Sk))
    return bias.astype(dtype)   # bf16 bias stream; added back in f32 in-kernel


def pallas_attention(q_arr, k_arr, v_arr, parts, attn_bias, num_heads, head_dim,
                     *, compute_dtype=_BF16, out_dtype=None):
    """q_arr/k_arr/v_arr: [n_parts, B, S*, NH*D] (may be the same array); `parts`
    selects the q/k/v plane via the BlockSpec index_map.  Output: [B, Sq, NH*D]."""
    _, B, Sq, _ = q_arr.shape
    Sk = k_arr.shape[2]
    D = head_dim
    P = num_heads * D
    G = _head_group(num_heads, D)
    n_hg = num_heads // G
    tq = _pick_tile(Sq, 256, 16 if _is_bf16(compute_dtype) else 8)
    n_sq = Sq // tq
    if out_dtype is None:
        out_dtype = compute_dtype
    qp_, kp_, vp_ = parts

    q_spec = pl.BlockSpec((1, 1, tq, G * D), lambda b, sq, hg: (qp_, b, sq, hg))
    k_spec = pl.BlockSpec((1, 1, Sk, G * D), lambda b, sq, hg: (kp_, b, 0, hg))
    v_spec = pl.BlockSpec((1, 1, Sk, G * D), lambda b, sq, hg: (vp_, b, 0, hg))
    o_spec = pl.BlockSpec((1, tq, G * D), lambda b, sq, hg: (b, sq, hg))

    if attn_bias is None:
        kernel = functools.partial(_attn_kernel_nobias, g_heads=G, d=D,
                                   compute_dtype=compute_dtype)
        in_specs = [q_spec, k_spec, v_spec]
        args = (q_arr, k_arr, v_arr)
    else:
        bias_dtype = _BF16 if _is_bf16(compute_dtype) else jnp.float32
        bias = _normalize_bias(attn_bias, B, num_heads, Sq, Sk, bias_dtype)
        bb, nhb = bias.shape[0], bias.shape[1]
        per_head = nhb != 1
        gb = G if per_head else 1
        if bb == 1 and per_head:
            bmap = lambda b, sq, hg: (0, hg, sq, 0)
        elif bb == 1:
            bmap = lambda b, sq, hg: (0, 0, sq, 0)
        elif per_head:
            bmap = lambda b, sq, hg: (b, hg, sq, 0)
        else:
            bmap = lambda b, sq, hg: (b, 0, sq, 0)
        b_spec = pl.BlockSpec((1, gb, tq, Sk), bmap)
        kernel = functools.partial(_attn_kernel_bias, g_heads=G, d=D,
                                   compute_dtype=compute_dtype, bias_per_head=per_head)
        in_specs = [q_spec, k_spec, v_spec, b_spec]
        args = (q_arr, k_arr, v_arr, bias)

    return pl.pallas_call(
        kernel,
        out_shape=jax.ShapeDtypeStruct((B, Sq, P), out_dtype),
        grid_spec=pltpu.PrefetchScalarGridSpec(
            num_scalar_prefetch=0,
            grid=(B, n_sq, n_hg),
            in_specs=in_specs,
            out_specs=o_spec,
        ),
        compiler_params=pltpu.CompilerParams(
            dimension_semantics=("parallel", "parallel", "parallel"),
            vmem_limit_bytes=_VMEM_LIMIT,
        ),
    )(*args)


# --------------------------------------------------------------------------
# Module wrapper (plain-JAX glue: only free reshapes between kernels)
# --------------------------------------------------------------------------
class MultiHeadAttentionPallas:
    """Pallas port of models.MultiHeadAttention (inference: dropout == identity).

    compute_dtype=jnp.bfloat16 (default): bf16 MXU inputs / bf16 intermediates
    with f32 accumulation.  Pass jnp.float32 for strict f32 parity.
    """

    def __init__(self, hidden_size, attention_dropout_rate, num_heads, key,
                 compute_dtype=_BF16):
        self.num_heads = num_heads
        self.att_size = hidden_size // num_heads
        self.scale = float(self.att_size) ** (-0.5)
        self.hidden_size = hidden_size
        self.compute_dtype = compute_dtype
        # attention_dropout_rate unused in inference (dropout == identity)

        P = num_heads * self.att_size

        def init_linear(k, in_f, out_f):
            kw, kb = jax.random.split(k)
            bound = 1.0 / (in_f ** 0.5)
            w = jax.random.uniform(kw, (in_f, out_f), jnp.float32, -bound, bound)
            b = jax.random.uniform(kb, (out_f,), jnp.float32, -bound, bound)
            return w, b

        kq, kk, kv, ko = jax.random.split(key, 4)
        wq, bq = init_linear(kq, hidden_size, P)
        wk, bk = init_linear(kk, hidden_size, P)
        wv, bv = init_linear(kv, hidden_size, P)
        wo, bo = init_linear(ko, P, hidden_size)

        # f32 master weights (mirror of the PyTorch params; used by the reference)
        self.w_qkv = jnp.stack([wq, wk, wv])   # [3, H, P]  (in,out layout)
        self.b_qkv = jnp.stack([bq, bk, bv])   # [3, P]
        self.wo, self.bo = wo, bo

        # kernel weights: softmax scale folded into the Q projection; stored in
        # compute_dtype (bf16 halves the weight DMA stream)
        self.w_qkv_kern = jnp.stack([wq * self.scale, wk, wv]).astype(compute_dtype)
        self.b_qkv_kern = jnp.stack([bq * self.scale, bk, bv])   # f32 [3, P]
        self.wo_kern = wo.astype(compute_dtype)
        self.bo_kern = bo                                        # f32

    def __call__(self, q, k, v, attn_bias=None):
        B, Sq, H = q.shape
        Sk = k.shape[1]
        NH, D = self.num_heads, self.att_size
        P = NH * D
        cd = self.compute_dtype

        if (q is k) and (k is v):
            # self-attention (the Graphormer encoder path): one fused QKV kernel,
            # x read once; the bf16 [3, B, S, P] planes feed attention with
            # zero copies / transposes.
            qkv = pallas_qkv_proj(q.reshape(B * Sq, H), self.w_qkv_kern,
                                  self.b_qkv_kern, compute_dtype=cd, out_dtype=cd)
            qkv = qkv.reshape(3, B, Sq, P)             # free reshape
            q_arr = k_arr = v_arr = qkv
            parts = (0, 1, 2)
        else:
            # rare cross-attention path: separate projections (routing by object
            # identity -- equal-but-distinct arrays take this slower path).
            qp = pallas_linear(q.reshape(B * Sq, H), self.w_qkv_kern[0],
                               self.b_qkv_kern[0], compute_dtype=cd, out_dtype=cd)
            kp = pallas_linear(k.reshape(B * Sk, H), self.w_qkv_kern[1],
                               self.b_qkv_kern[1], compute_dtype=cd, out_dtype=cd)
            vp = pallas_linear(v.reshape(B * Sk, H), self.w_qkv_kern[2],
                               self.b_qkv_kern[2], compute_dtype=cd, out_dtype=cd)
            q_arr = qp.reshape(1, B, Sq, P)
            k_arr = kp.reshape(1, B, Sk, P)
            v_arr = vp.reshape(1, B, Sk, P)
            parts = (0, 0, 0)

        # attention output comes out directly in lane-dense [B, Sq, NH*D]
        ctx = pallas_attention(q_arr, k_arr, v_arr, parts, attn_bias, NH, D,
                               compute_dtype=cd, out_dtype=cd)
        out = pallas_linear(ctx.reshape(B * Sq, P), self.wo_kern, self.bo_kern,
                            compute_dtype=cd, out_dtype=jnp.float32)
        return out.reshape(B, Sq, H)


# --------------------------------------------------------------------------
# Pure-JAX reference (mirrors the PyTorch forward) for sanity checks
# --------------------------------------------------------------------------
def _reference_mha(m, q, k, v, attn_bias):
    B, Sq, H = q.shape
    Sk = k.shape[1]
    NH, D = m.num_heads, m.att_size
    qp = (q @ m.w_qkv[0] + m.b_qkv[0]).reshape(B, Sq, NH, D).transpose(0, 2, 1, 3)
    kp = (k @ m.w_qkv[1] + m.b_qkv[1]).reshape(B, Sk, NH, D).transpose(0, 2, 1, 3)
    vp = (v @ m.w_qkv[2] + m.b_qkv[2]).reshape(B, Sk, NH, D).transpose(0, 2, 1, 3)
    s = jnp.einsum("bhqd,bhkd->bhqk", qp * m.scale, kp)
    if attn_bias is not None:
        s = s + jnp.asarray(attn_bias, jnp.float32)
    p = jax.nn.softmax(s, axis=-1)
    ctx = jnp.einsum("bhqk,bhkd->bhqd", p, vp).transpose(0, 2, 1, 3)
    ctx = ctx.reshape(B, Sq, NH * D)
    return ctx @ m.wo + m.bo


if __name__ == "__main__":
    key = jax.random.PRNGKey(0)
    k_params, k_x, k_b1, k_b2 = jax.random.split(key, 4)

    batch, seq, hidden, num_heads = 2, 8, 32, 4
    x = jax.random.normal(k_x, (batch, seq, hidden), jnp.float32)
    bias_shared = jax.random.normal(k_b1, (1, 1, seq, seq), jnp.float32)
    bias_perhead = jax.random.normal(k_b2, (1, num_heads, seq, seq), jnp.float32)

    # default bf16 compute; an f32 instance (same params) checks strict parity
    mha_bf16 = MultiHeadAttentionPallas(hidden, 0.1, num_heads, k_params)
    mha_f32 = MultiHeadAttentionPallas(hidden, 0.1, num_heads, k_params,
                                       compute_dtype=jnp.float32)

    outs = {}
    for name, m in (("bf16", mha_bf16), ("f32", mha_f32)):
        outs[name] = (
            m(x, x, x, attn_bias=None),
            m(x, x, x, attn_bias=bias_shared),
            m(x, x, x, attn_bias=bias_perhead),
        )
    jax.block_until_ready(outs)

    refs = (
        _reference_mha(mha_f32, x, x, x, None),
        _reference_mha(mha_f32, x, x, x, bias_shared),
        _reference_mha(mha_f32, x, x, x, bias_perhead),
    )

    for o in outs["bf16"] + outs["f32"]:
        assert o.shape == (batch, seq, hidden)
    # f32 kernel path: tight match (only approx-reciprocal softmax norm differs).
    for o, r in zip(outs["f32"], refs):
        assert jnp.allclose(o, r, rtol=1e-2, atol=1e-2)
    # bf16 default path: looser tolerance covers bf16 weight/activation quantization.
    for o, r in zip(outs["bf16"], refs):
        assert jnp.allclose(o, r, rtol=5e-2, atol=5e-2)
    print("KERNEL_OK")
</pallas_src>

<mosaic_0001>
module attributes {stable_mosaic.version = 11 : i64} {
  func.func @_qkv_kernel(%arg0: i32, %arg1: i32, %arg2: i32, %arg3: memref<16x32xf32, #tpu.memory_space<vmem>>, %arg4: memref<3x32x32xbf16, #tpu.memory_space<vmem>>, %arg5: memref<3x1x32xf32, #tpu.memory_space<vmem>>, %arg6: memref<3x16x32xbf16, #tpu.memory_space<vmem>>, %arg7: memref<3x16x32xf32, #tpu.memory_space<vmem>>) attributes {dimension_semantics = [#tpu.dimension_semantics<parallel>, #tpu.dimension_semantics<parallel>, #tpu.dimension_semantics<arbitrary>], iteration_bounds = array<i64: 1, 1, 1>, scalar_prefetch = 0 : i64, scratch_operands = 1 : i64, tpu.core_type = #tpu.core_type<tc>, window_params = [{transform_indices = @transform_0, window_bounds = array<i64: 16, 32>}, {transform_indices = @transform_1, window_bounds = array<i64: 3, 32, 32>}, {transform_indices = @transform_2, window_bounds = array<i64: 3, 1, 32>}, {transform_indices = @transform_3, window_bounds = array<i64: 3, 16, 32>}]} {
    %c0_i32 = arith.constant 0 : i32
    %0 = arith.cmpi eq, %arg2, %c0_i32 : i32
    %1 = arith.extui %0 : i1 to i32
    %c0_i32_0 = arith.constant 0 : i32
    %2 = arith.cmpi ne, %1, %c0_i32_0 : i32
    scf.if %2 {
      %cst_31 = arith.constant 0.000000e+00 : f32
      %35 = vector.broadcast %cst_31 : f32 to vector<3x16x32xf32>
      %c0_32 = arith.constant 0 : index
      %c0_33 = arith.constant 0 : index
      %c0_34 = arith.constant 0 : index
      %36 = vector.load %arg7[%c0_32, %c0_33, %c0_34] : memref<3x16x32xf32, #tpu.memory_space<vmem>>, vector<3x16x32xf32>
      tpu.vector_store %arg7[%c0_32, %c0_33, %c0_34], %35 {strides = array<i32>} : memref<3x16x32xf32, #tpu.memory_space<vmem>>, vector<3x16x32xf32>,
    } else {
    }
    %c0 = arith.constant 0 : index
    %c0_1 = arith.constant 0 : index
    %3 = vector.load %arg3[%c0, %c0_1] : memref<16x32xf32, #tpu.memory_space<vmem>>, vector<16x32xf32>
    %4 = arith.truncf %3 : vector<16x32xf32> to vector<16x32xbf16>
    %c0_2 = arith.constant 0 : index
    %c0_3 = arith.constant 0 : index
    %c0_4 = arith.constant 0 : index
    %5 = vector.load %arg7[%c0_2, %c0_3, %c0_4] : memref<3x16x32xf32, #tpu.memory_space<vmem>>, vector<1x16x32xf32>
    %6 = vector.shape_cast %5 : vector<1x16x32xf32> to vector<16x32xf32>
    %c0_5 = arith.constant 0 : index
    %c0_6 = arith.constant 0 : index
    %c0_7 = arith.constant 0 : index
    %7 = vector.load %arg4[%c0_5, %c0_6, %c0_7] : memref<3x32x32xbf16, #tpu.memory_space<vmem>>, vector<1x32x32xbf16>
    %8 = vector.shape_cast %7 : vector<1x32x32xbf16> to vector<32x32xbf16>
    %cst = arith.constant dense<0.000000e+00> : vector<16x32xf32>
    %9 = tpu.matmul %4, %8, %cst {dimension_numbers = #tpu.dot_dimension_numbers<[1], [0], [0], [1], [0, 0, 1, 1], [], []>} : vector<16x32xbf16>, vector<32x32xbf16>, vector<16x32xf32> -> vector<16x32xf32>
    %10 = arith.addf %6, %9 : vector<16x32xf32>
    %c0_8 = arith.constant 0 : index
    %c0_9 = arith.constant 0 : index
    %c0_10 = arith.constant 0 : index
    %11 = vector.load %arg7[%c0_8, %c0_9, %c0_10] : memref<3x16x32xf32, #tpu.memory_space<vmem>>, vector<1x16x32xf32>
    %12 = vector.shape_cast %11 : vector<1x16x32xf32> to vector<16x32xf32>
    %13 = vector.shape_cast %10 : vector<16x32xf32> to vector<1x16x32xf32>
    tpu.vector_store %arg7[%c0_8, %c0_9, %c0_10], %13 {strides = array<i32>} : memref<3x16x32xf32, #tpu.memory_space<vmem>>, vector<1x16x32xf32>,
    %c1 = arith.constant 1 : index
    %c0_11 = arith.constant 0 : index
    %c0_12 = arith.constant 0 : index
    %14 = vector.load %arg7[%c1, %c0_11, %c0_12] : memref<3x16x32xf32, #tpu.memory_space<vmem>>, vector<1x16x32xf32>
    %15 = vector.shape_cast %14 : vector<1x16x32xf32> to vector<16x32xf32>
    %c1_13 = arith.constant 1 : index
    %c0_14 = arith.constant 0 : index
    %c0_15 = arith.constant 0 : index
    %16 = vector.load %arg4[%c1_13, %c0_14, %c0_15] : memref<3x32x32xbf16, #tpu.memory_space<vmem>>, vector<1x32x32xbf16>
    %17 = vector.shape_cast %16 : vector<1x32x32xbf16> to vector<32x32xbf16>
    %cst_16 = arith.constant dense<0.000000e+00> : vector<16x32xf32>
    %18 = tpu.matmul %4, %17, %cst_16 {dimension_numbers = #tpu.dot_dimension_numbers<[1], [0], [0], [1], [0, 0, 1, 1], [], []>} : vector<16x32xbf16>, vector<32x32xbf16>, vector<16x32xf32> -> vector<16x32xf32>
    %19 = arith.addf %15, %18 : vector<16x32xf32>
    %c1_17 = arith.constant 1 : index
    %c0_18 = arith.constant 0 : index
    %c0_19 = arith.constant 0 : index
    %20 = vector.load %arg7[%c1_17, %c0_18, %c0_19] : memref<3x16x32xf32, #tpu.memory_space<vmem>>, vector<1x16x32xf32>
    %21 = vector.shape_cast %20 : vector<1x16x32xf32> to vector<16x32xf32>
    %22 = vector.shape_cast %19 : vector<16x32xf32> to vector<1x16x32xf32>
    tpu.vector_store %arg7[%c1_17, %c0_18, %c0_19], %22 {strides = array<i32>} : memref<3x16x32xf32, #tpu.memory_space<vmem>>, vector<1x16x32xf32>,
    %c2 = arith.constant 2 : index
    %c0_20 = arith.constant 0 : index
    %c0_21 = arith.constant 0 : index
    %23 = vector.load %arg7[%c2, %c0_20, %c0_21] : memref<3x16x32xf32, #tpu.memory_space<vmem>>, vector<1x16x32xf32>
    %24 = vector.shape_cast %23 : vector<1x16x32xf32> to vector<16x32xf32>
    %c2_22 = arith.constant 2 : index
    %c0_23 = arith.constant 0 : index
    %c0_24 = arith.constant 0 : index
    %25 = vector.load %arg4[%c2_22, %c0_23, %c0_24] : memref<3x32x32xbf16, #tpu.memory_space<vmem>>, vector<1x32x32xbf16>
    %26 = vector.shape_cast %25 : vector<1x32x32xbf16> to vector<32x32xbf16>
    %cst_25 = arith.constant dense<0.000000e+00> : vector<16x32xf32>
    %27 = tpu.matmul %4, %26, %cst_25 {dimension_numbers = #tpu.dot_dimension_numbers<[1], [0], [0], [1], [0, 0, 1, 1], [], []>} : vector<16x32xbf16>, vector<32x32xbf16>, vector<16x32xf32> -> vector<16x32xf32>
    %28 = arith.addf %24, %27 : vector<16x32xf32>
    %c2_26 = arith.constant 2 : index
    %c0_27 = arith.constant 0 : index
    %c0_28 = arith.constant 0 : index
    %29 = vector.load %arg7[%c2_26, %c0_27, %c0_28] : memref<3x16x32xf32, #tpu.memory_space<vmem>>, vector<1x16x32xf32>
    %30 = vector.shape_cast %29 : vector<1x16x32xf32> to vector<16x32xf32>
    %31 = vector.shape_cast %28 : vector<16x32xf32> to vector<1x16x32xf32>
    tpu.vector_store %arg7[%c2_26, %c0_27, %c0_28], %31 {strides = array<i32>} : memref<3x16x32xf32, #tpu.memory_space<vmem>>, vector<1x16x32xf32>,
    %c0_i32_29 = arith.constant 0 : i32
    %32 = arith.cmpi eq, %arg2, %c0_i32_29 : i32
    %33 = arith.extui %32 : i1 to i32
    %c0_i32_30 = arith.constant 0 : i32
    %34 = arith.cmpi ne, %33, %c0_i32_30 : i32
    scf.if %34 {
      %c0_31 = arith.constant 0 : index
      %c0_32 = arith.constant 0 : index
      %c0_33 = arith.constant 0 : index
      %35 = vector.load %arg7[%c0_31, %c0_32, %c0_33] : memref<3x16x32xf32, #tpu.memory_space<vmem>>, vector<3x16x32xf32>
      %c0_34 = arith.constant 0 : index
      %c0_35 = arith.constant 0 : index
      %c0_36 = arith.constant 0 : index
      %36 = vector.load %arg5[%c0_34, %c0_35, %c0_36] : memref<3x1x32xf32, #tpu.memory_space<vmem>>, vector<3x1x32xf32>
      %37 = vector.broadcast %36 : vector<3x1x32xf32> to vector<3x16x32xf32>
      %38 = arith.addf %35, %37 : vector<3x16x32xf32>
      %39 = arith.truncf %38 : vector<3x16x32xf32> to vector<3x16x32xbf16>
      %c0_37 = arith.constant 0 : index
      %c0_38 = arith.constant 0 : index
      %c0_39 = arith.constant 0 : index
      %40 = vector.load %arg6[%c0_37, %c0_38, %c0_39] : memref<3x16x32xbf16, #tpu.memory_space<vmem>>, vector<3x16x32xbf16>
      tpu.vector_store %arg6[%c0_37, %c0_38, %c0_39], %39 {strides = array<i32>} : memref<3x16x32xbf16, #tpu.memory_space<vmem>>, vector<3x16x32xbf16>,
    } else {
    }
    return
  }
  func.func @transform_0(%arg0: i32, %arg1: i32, %arg2: i32) -> (i32, i32) {
    %c0_i32 = arith.constant 0 : i32
    return %arg0, %arg2 : i32, i32
  }
  func.func @transform_1(%arg0: i32, %arg1: i32, %arg2: i32) -> (i32, i32, i32) {
    %c0_i32 = arith.constant 0 : i32
    %c0_i32_0 = arith.constant 0 : i32
    return %c0_i32, %arg2, %arg1 : i32, i32, i32
  }
  func.func @transform_2(%arg0: i32, %arg1: i32, %arg2: i32) -> (i32, i32, i32) {
    %c0_i32 = arith.constant 0 : i32
    %c0_i32_0 = arith.constant 0 : i32
    %c0_i32_1 = arith.constant 0 : i32
    return %c0_i32, %c0_i32_0, %arg1 : i32, i32, i32
  }
  func.func @transform_3(%arg0: i32, %arg1: i32, %arg2: i32) -> (i32, i32, i32) {
    %c0_i32 = arith.constant 0 : i32
    %c0_i32_0 = arith.constant 0 : i32
    return %c0_i32, %arg0, %arg1 : i32, i32, i32
  }
}

</mosaic_0001>

<bundles_post_ra>
// kernel: tpu_custom_call.1
= control target key start
LH: loop header
LB: loop body
LE: loop exit
PB: predicated region body
PF: predicated region fallthrough
CT: control target
= control target key end

     0   :  { %8 = vsyncpa [#allocation4], 0  ;;  %s588_s0 = inlined_call_operand.hbm [shape: f32[16,32], index: 0, kind: input, shape index: {}]   ;;  %s589_s1 = inlined_call_operand.hbm [shape: bf16[3,32,32], index: 1, kind: input, shape index: {}]   ;;  %s590_s2 = inlined_call_operand.vmem [shape: f32[3,1,32], index: 2, kind: input, shape index: {}]   ;;  %s591_s3 = inlined_call_operand.hbm [shape: bf16[3,16,32], index: 3, kind: output, shape index: {}]  }
   0x1   :  { %9 = vsyncpa [#allocation7], 0 }
   0x2   :  { %10 = vsyncpa [#allocation5], 0  ;;  %s484_s12 = smov [#allocation3]   ;;  %s412_s16 = scalar_lea.hbm %s588_s0, 256 }
   0x3   :  { %s16_s13 = sshll.u32 %s484_s12, 4  ;;  %p413_p0 = scmp.ne.s32.totalorder %s588_s0, %s412_s16  ;;  %s17_s13 = int_to_ptr.vmem [resolvable:$true] %s16_s13 }
   0x4   :  { %p416_p1 = scmp.lt.u32.totalorder %s412_s16, %s588_s0 }
   0x6   :  { %p418_p2 = pnand %p416_p1, %p413_p0 }
   0x8   :  { %421 = shalt.err (!%p418_p2)
}
   0x9   :  { %s422_s21 = scalar_lea.vmem %s17_s13, 256  ;;  %p427_p4 = scmp.lt.s32.totalorder %s17_s13, %s17_s13 }
   0xa   :  { %p423_p3 = scmp.ne.s32.totalorder %s17_s13, %s422_s21  ;;  %p428_p5 = scmp.lt.s32.totalorder %s422_s21, %s422_s21 }
   0xc   :  { %p429_p6 = por %p428_p5, %p427_p4 }
   0xe   :  { %p430_p7 = pnand %p429_p6, %p423_p3 }
  0x10   :  { %433 = shalt.err (!%p430_p7)
}
  0x11   :  { %s485_s22 = smov 128   ;;  %s486_s23 = smov 8  }
  0x12   :  { %22 = dma.hbm_to_vmem [thread:$0]  %s588_s0, 256, %s17_s13, [#allocation4], %s485_s22, %s485_s22, %s486_s23  }
  0x13   :  { %s487_s26 = smov [#allocation6]   ;;  %s434_s30 = scalar_lea.hbm %s589_s1, 768 }
  0x14   :  { %s28_s27 = sshll.u32 %s487_s26, 4  ;;  %p435_p8 = scmp.ne.s32.totalorder %s589_s1, %s434_s30  ;;  %s29_s27 = int_to_ptr.vmem [resolvable:$true] %s28_s27 }
  0x15   :  { %p438_p9 = scmp.lt.u32.totalorder %s434_s30, %s589_s1 }
  0x17   :  { %p440_p10 = pnand %p438_p9, %p435_p8 }
  0x19   :  { %443 = shalt.err (!%p440_p10)
}
  0x1a   :  { %s444_s8 = scalar_lea.vmem %s29_s27, 768  ;;  %p449_p12 = scmp.lt.s32.totalorder %s29_s27, %s29_s27 }
  0x1b   :  { %p445_p11 = scmp.ne.s32.totalorder %s29_s27, %s444_s8  ;;  %p450_p13 = scmp.lt.s32.totalorder %s444_s8, %s444_s8 }
  0x1d   :  { %p451_p0 = por %p450_p13, %p449_p12 }
  0x1f   :  { %p452_p1 = pnand %p451_p0, %p445_p11 }
  0x21   :  { %455 = shalt.err (!%p452_p1)
}
  0x22   :  { %s488_s0 = smov 64   ;;  %s489_s9 = smov 4  }
  0x23   :  { %34 = dma.hbm_to_vmem [thread:$0]  %s589_s1, 768, %s29_s27, [#allocation7], %s488_s0, %s488_s0, %s489_s9  }
  0x24   :  { %478 = dma.done.wait [#allocation4], 256  }
  0x25   :  { %479 = vsyncadd [#allocation4], 4294967040 }
  0x26   :  { %480 = dma.done.wait [#allocation7], 768  }
  0x27   :  { %481 = vsyncadd [#allocation7], 4294966528  ;;  %vm48_vm0 = vcmask 261120   ;;  %v490_v0 = vmov 0.0   ;;  %vm491_vm1 = vmmov 0   ;;  %v406_v1 = vld [vmem:[#allocation6] sm:$0xff]  }
  0x28   :  { %373 = vmatprep.subr.bf16.mxu0 %v490_v0  ;;  %381 = vmatprep.subr.bf16.mxu1 %v490_v0  ;;  %49 = vst.msk [vmem:[#allocation2] sm:$0xff] %vm48_vm0, %v490_v0  ;;  %50 = vst.msk [vmem:[#allocation2 + $0x8] sm:$0xff] %vm48_vm0, %v490_v0  ;;  %v407_v2 = vld [vmem:[#allocation6 + $0x8] sm:$0xff]   ;;  %v408_v3 = vld [vmem:[#allocation6 + $0x10] sm:$0xff]   ;;  %vm315_vm2 = vcmask 257024   ;;  %s492_s17 = smov [#allocation8]  }
  0x29   :  { %51 = vst.msk [vmem:[#allocation2 + $0x10] sm:$0xff] %vm48_vm0, %v490_v0  ;;  %52 = vst.msk [vmem:[#allocation2 + $0x18] sm:$0xff] %vm48_vm0, %v490_v0  ;;  %377 = vmatprep.mubr.msk.bf16.mxu0 %vm491_vm1, %v490_v0  ;;  %385 = vmatprep.mubr.msk.bf16.mxu1 %vm491_vm1, %v490_v0  ;;  %v55_v4 = vld [vmem:[#allocation3] sm:$0xff]  ;;  %v56_v5 = vld [vmem:[#allocation3 + $0x8] sm:$0xff]  ;;  %s327_s18 = sshll.u32 %s492_s17, 4  ;;  %s328_s18 = int_to_ptr.vmem [resolvable:$true] %s327_s18 }
  0x2a   :  { %53 = vst.msk [vmem:[#allocation2 + $0x20] sm:$0xff] %vm48_vm0, %v490_v0  ;;  %54 = vst.msk [vmem:[#allocation2 + $0x28] sm:$0xff] %vm48_vm0, %v490_v0  ;;  %374 = vmatpush3.bf16.msra.mxu0 %v406_v1  ;;  %382 = vmatpush3.bf16.msra.mxu1 %v408_v3  ;;  %v57_v6 = vpack.c.bf16 %v56_v5, %v55_v4  ;;  %v410_v7 = vld [vmem:[#allocation6 + $0x18] sm:$0xff]   ;;  %v409_v8 = vld [vmem:[#allocation6 + $0x20] sm:$0xff]   ;;  %p461_p3 = scmp.lt.s32.totalorder %s328_s18, %s328_s18 }
  0x2b   :  { %375 = vmatprep.subr.bf16.mxu0 %v490_v0  ;;  %383 = vmatprep.subr.bf16.mxu1 %v490_v0  ;;  %v411_v9 = vld [vmem:[#allocation6 + $0x28] sm:$0xff]   ;;  %v349_v29 = vld [vmem:[%s590_s2] ss:$0 sm:$0xff]  ;;  %v350_v34 = vld [vmem:[%s590_s2 + $0x1] ss:$0 sm:$0xff] }
  0x2c   :  { %v351_v47 = vld [vmem:[%s590_s2 + $0x2] ss:$0 sm:$0xff]  ;;  %s456_s2 = scalar_lea.vmem %s328_s18, 384 }
  0x2d   :  { %p457_p2 = scmp.ne.s32.totalorder %s328_s18, %s456_s2  ;;  %p462_p4 = scmp.lt.s32.totalorder %s456_s2, %s456_s2 }
  0x2e   :  { %376 = vmatpush3.bf16.msra.mxu0 %v407_v2  ;;  %384 = vmatpush3.bf16.msra.mxu1 %v410_v7 }
  0x2f   :  { %389 = vmatprep.subr.bf16.mxu0 %v490_v0  ;;  %v58_v10 = vld [vmem:[#allocation2] sm:$0xff]  ;;  %v59_v12 = vld [vmem:[#allocation2 + $0x8] sm:$0xff]  ;;  %p463_p5 = por %p462_p4, %p461_p3 }
  0x30   :  { %v126_v13 = vld [vmem:[#allocation2 + $0x10] sm:$0xff]  ;;  %v127_v18 = vld [vmem:[#allocation2 + $0x18] sm:$0xff] }
  0x31   :  { %378 = vmatmul.mubr.msk.bf16.vlgmr.msra.gmra.mrb[0].mxu0 %vm48_vm0, %v57_v6  ;;  %386 = vmatmul.mubr.msk.bf16.vlgmr.msra.gmra.mrb[0].mxu1 %vm48_vm0, %v57_v6  ;;  %v191_v26 = vld [vmem:[#allocation2 + $0x20] sm:$0xff]  ;;  %v192_v28 = vld [vmem:[#allocation2 + $0x28] sm:$0xff]  ;;  %p464_p6 = pnand %p463_p5, %p457_p2 }
  0x32   :  { %390 = vmatpush3.bf16.msra.mxu0 %v409_v8  ;;  %393 = vmatprep.mubr.msk.bf16.mxu0 %vm491_vm1, %v490_v0 }
  0x33   :  { %391 = vmatprep.subr.bf16.mxu0 %v490_v0 }
  0x36   :  { %392 = vmatpush3.bf16.msra.mxu0 %v411_v9 }
  0x39   :  { %394 = vmatmul.mubr.msk.bf16.vlgmr.msra.gmra.mrb[4].mxu0 %vm48_vm0, %v57_v6 }
 0x104   :  { %v114_v11 = vpop.f32.mrb[0].mxu0  ;;  %v179_v17 = vpop.f32.mrb[0].mxu1 }
 0x105   :  { %v121_v14 = vadd.f32 %v114_v11, %v58_v10  ;;  %v379_v15 = vpop.f32.mrb[1].mxu0  ;;  %v186_v21 = vadd.f32 %v179_v17, %v126_v13  ;;  %v387_v22 = vpop.f32.mrb[1].mxu1 }
 0x106   :  { %v117_v16 = vpop.f32.mrb[2].mxu0  ;;  %v182_v23 = vpop.f32.mrb[2].mxu1 }
 0x107   :  { %123 = vst.msk [vmem:[#allocation2] sm:$0xff] %vm48_vm0, %v121_v14  ;;  %v122_v19 = vadd.f32 %v117_v16, %v59_v12  ;;  %v380_v20 = vpop.f32.mrb[3].mxu0  ;;  %188 = vst.msk [vmem:[#allocation2 + $0x10] sm:$0xff] %vm48_vm0, %v186_v21  ;;  %v187_v24 = vadd.f32 %v182_v23, %v127_v18  ;;  %v388_v25 = vpop.f32.mrb[3].mxu1 }
 0x109   :  { %124 = vst.msk [vmem:[#allocation2 + $0x8] sm:$0xff] %vm48_vm0, %v122_v19  ;;  %189 = vst.msk [vmem:[#allocation2 + $0x18] sm:$0xff] %vm48_vm0, %v187_v24 }
 0x10c   :  { %v244_v27 = vpop.f32.mrb[4].mxu0 }
 0x10d   :  { %v251_v30 = vadd.f32 %v244_v27, %v191_v26  ;;  %v395_v31 = vpop.f32.mrb[5].mxu0 }
 0x10e   :  { %v247_v32 = vpop.f32.mrb[6].mxu0  ;;  %v258_v33 = vld [vmem:[#allocation2] sm:$0xff]  ;;  %v260_v39 = vld [vmem:[#allocation2 + $0x10] sm:$0xff] }
 0x10f   :  { %253 = vst.msk [vmem:[#allocation2 + $0x20] sm:$0xff] %vm48_vm0, %v251_v30  ;;  %v252_v35 = vadd.f32 %v247_v32, %v192_v28  ;;  %v396_v36 = vpop.f32.mrb[7].mxu0  ;;  %v285_v37 = vadd.f32 %v349_v29, %v258_v33  ;;  %v287_v41 = vadd.f32 %v350_v34, %v260_v39 }
 0x110   :  { %v259_v38 = vld [vmem:[#allocation2 + $0x8] sm:$0xff]  ;;  %v261_v43 = vld [vmem:[#allocation2 + $0x18] sm:$0xff] }
 0x111   :  { %254 = vst.msk [vmem:[#allocation2 + $0x28] sm:$0xff] %vm48_vm0, %v252_v35  ;;  %v286_v40 = vadd.f32 %v349_v29, %v259_v38  ;;  %v358_v42 = vpack.c.bf16 %v285_v37, %v285_v37  ;;  %v288_v44 = vadd.f32 %v350_v34, %v261_v43  ;;  %v360_v46 = vpack.c.bf16 %v287_v41, %v287_v41 }
 0x113   :  { %v359_v45 = vpack.c.bf16 %v286_v40, %v286_v40  ;;  %316 = vst.msk [vmem:[#allocation8] sm:$0xf] %vm315_vm2, %v358_v42  ;;  %v361_v48 = vpack.c.bf16 %v288_v44, %v288_v44  ;;  %318 = vst.msk [vmem:[#allocation8 + $0x8] sm:$0xf] %vm315_vm2, %v360_v46 }
 0x115   :  { %317 = vst.msk [vmem:[#allocation8 + $0x4] sm:$0xf] %vm315_vm2, %v359_v45  ;;  %319 = vst.msk [vmem:[#allocation8 + $0xc] sm:$0xf] %vm315_vm2, %v361_v48 }
 0x116   :  { %v262_v49 = vld [vmem:[#allocation2 + $0x20] sm:$0xff] }
 0x117   :  { %v289_v50 = vadd.f32 %v351_v47, %v262_v49 }
 0x118   :  { %v263_v51 = vld [vmem:[#allocation2 + $0x28] sm:$0xff] }
 0x119   :  { %v290_v52 = vadd.f32 %v351_v47, %v263_v51  ;;  %v362_v53 = vpack.c.bf16 %v289_v50, %v289_v50 }
 0x11b   :  { %v363_v54 = vpack.c.bf16 %v290_v52, %v290_v52  ;;  %320 = vst.msk [vmem:[#allocation8 + $0x10] sm:$0xf] %vm315_vm2, %v362_v53 }
 0x11d   :  { %321 = vst.msk [vmem:[#allocation8 + $0x14] sm:$0xf] %vm315_vm2, %v363_v54 }
 0x11e   :  { %467 = shalt.err (!%p464_p6)
}
 0x11f   :  { %s468_s21 = scalar_lea.hbm %s591_s3, 384 }
 0x120   :  { %p469_p7 = scmp.ne.s32.totalorder %s591_s3, %s468_s21  ;;  %p472_p8 = scmp.lt.u32.totalorder %s468_s21, %s591_s3 }
 0x122   :  { %p474_p9 = pnand %p472_p8, %p469_p7 }
 0x124   :  { %477 = shalt.err (!%p474_p9)
}
 0x125   :  { %333 = dma.vmem_to_hbm [thread:$0]  %s328_s18, 384, %s591_s3, [#allocation5], %s488_s0, %s488_s0, %s489_s9  }
 0x126   :  { %482 = dma.done.wait [#allocation5], 384  }
 0x127   :  { %483 = vsyncadd [#allocation5], 4294966912 }
 0x128   :  { %337 = vsyncpa [#allocation4], 1 }
 0x129   :  { %338 = vsyncpa [#allocation7], 1 }
 0x12a   :  { %339 = vsyncpa [#allocation5], 1 }

</bundles_post_ra>
